<compile_context>
chip_gen: v6e
topology: v6e:2x2x1
jax: 0.10.0
libtpu: 0.0.40
codegen_flags: <defaults>
</compile_context>

<pallas_src>
import math
import functools

import jax
import jax.numpy as jnp
from jax.experimental import pallas as pl
from jax.experimental.pallas import tpu as pltpu


def _bert_scan_attention_kernel(
    scan_ref,    # (1, S, SCAN_H)   bf16
    hid_ref,     # (1, T_tile, H)   f32
    wq_ref,      # (1, H, d)        bf16
    bq_ref,      # (1, 1, d)        f32
    wk_ref,      # (1, SCAN_H, d)   bf16
    bk_ref,      # (1, 1, d)        f32
    wv_ref,      # (1, SCAN_H, d)   bf16
    bv_ref,      # (1, 1, d)        f32
    wo_ref,      # (1, d, H)        bf16
    bo_ref,      # (1, H)           f32
    gamma_ref,   # (1, H)           f32
    beta_ref,    # (1, H)           f32
    out_ref,     # (1, T_tile, H)
    acc_ref,     # (T_tile, H)      f32 VMEM scratch, persistent across heads
    *,
    head_dim: int,
    ln_eps: float,
):
    h = pl.program_id(2)
    num_heads = pl.num_programs(2)

    scan_bf = scan_ref[0]                       # (S, SCAN_H) bf16
    hid_f32 = hid_ref[0]                        # (T, H)      f32 (residual path)
    hid_bf = hid_f32.astype(jnp.bfloat16)

    # This head's Q / K / V projections: 2-D bf16 MXU matmuls, f32 accumulation.
    q = jnp.dot(hid_bf, wq_ref[0], preferred_element_type=jnp.float32) + bq_ref[0]
    k = jnp.dot(scan_bf, wk_ref[0], preferred_element_type=jnp.float32) + bk_ref[0]
    v = jnp.dot(scan_bf, wv_ref[0], preferred_element_type=jnp.float32) + bv_ref[0]

    # Scaled dot-product attention for this head (softmax stats in f32).
    scale = 1.0 / math.sqrt(head_dim)
    s = jnp.einsum(
        "td,sd->ts",
        q.astype(jnp.bfloat16), k.astype(jnp.bfloat16),
        preferred_element_type=jnp.float32,
    ) * scale                                   # (T, S) f32
    s = s - jnp.max(s, axis=-1, keepdims=True)
    p = jnp.exp(s)
    p = p * pl.reciprocal(jnp.sum(p, axis=-1, keepdims=True), approx=True)

    ctx = jnp.dot(p.astype(jnp.bfloat16), v.astype(jnp.bfloat16),
                  preferred_element_type=jnp.float32)          # (T, d)

    # concat(heads) @ Wo == sum_h ctx_h @ Wo[h*d:(h+1)*d, :] -> accumulate.
    partial = jnp.dot(ctx.astype(jnp.bfloat16), wo_ref[0],
                      preferred_element_type=jnp.float32)      # (T, H)

    @pl.when(h == 0)
    def _():
        acc_ref[...] = jnp.zeros_like(acc_ref)

    acc_ref[...] += partial

    # Last head: BertSelfOutput = output bias + residual + LayerNorm, store.
    @pl.when(h == num_heads - 1)
    def _():
        x = acc_ref[...] + bo_ref[...] + hid_f32
        mean = jnp.mean(x, axis=-1, keepdims=True)
        xc = x - mean
        var = jnp.mean(xc * xc, axis=-1, keepdims=True)
        normed = xc * jax.lax.rsqrt(var + ln_eps)
        out = normed * gamma_ref[...] + beta_ref[...]
        out_ref[0] = out.astype(out_ref.dtype)


def bert_scan_attention(scan_encodings, hidden_states, attention_mask, params,
                        *, num_heads, ln_eps=1e-12, t_tile=None,
                        out_dtype=jnp.float32):
    # attention_mask is unused (matches the PyTorch forward). Kept for parity.
    del attention_mask
    B, S, scan_h = scan_encodings.shape
    _, T, H = hidden_states.shape
    if H % num_heads != 0:
        raise ValueError("hidden_size must be divisible by num_attention_heads")
    nh = num_heads
    d = H // nh

    # Row-tile over the text sequence (full T for small sequences).
    if t_tile is None:
        t_tile = 256 if (T > 256 and T % 256 == 0) else T
    elif T % t_tile != 0:
        t_tile = T
    nt = T // t_tile

    cdt = jnp.bfloat16  # MXU compute dtype; accumulation stays f32 in-kernel.

    # Pre-stack per-head weight slices so the kernel only does 2-D matmuls.
    wq_h = params["wq"].reshape(H, nh, d).transpose(1, 0, 2).astype(cdt)       # (nh, H, d)
    wk_h = params["wk"].reshape(scan_h, nh, d).transpose(1, 0, 2).astype(cdt)  # (nh, SCAN_H, d)
    wv_h = params["wv"].reshape(scan_h, nh, d).transpose(1, 0, 2).astype(cdt)  # (nh, SCAN_H, d)
    wo_h = params["wo"].reshape(nh, d, H).astype(cdt)                          # (nh, d, H)
    bq_h = params["bq"].reshape(nh, 1, d).astype(jnp.float32)
    bk_h = params["bk"].reshape(nh, 1, d).astype(jnp.float32)
    bv_h = params["bv"].reshape(nh, 1, d).astype(jnp.float32)
    bo = params["bo"].reshape(1, H).astype(jnp.float32)
    gamma = params["gamma"].reshape(1, H).astype(jnp.float32)
    beta = params["beta"].reshape(1, H).astype(jnp.float32)

    scan_bf = scan_encodings.astype(cdt)              # halves K/V DMA bytes
    hid_f32 = hidden_states.astype(jnp.float32)       # kept f32 for residual

    kernel = functools.partial(
        _bert_scan_attention_kernel, head_dim=d, ln_eps=ln_eps)

    head_spec = lambda shape: pl.BlockSpec(shape, lambda b, t, h: (h, 0, 0))
    const_spec = lambda shape: pl.BlockSpec(shape, lambda b, t, h: (0, 0))

    grid_spec = pltpu.PrefetchScalarGridSpec(
        num_scalar_prefetch=0,
        grid=(B, nt, nh),
        in_specs=[
            pl.BlockSpec((1, S, scan_h), lambda b, t, h: (b, 0, 0)),   # scan
            pl.BlockSpec((1, t_tile, H), lambda b, t, h: (b, t, 0)),   # hidden
            head_spec((1, H, d)), head_spec((1, 1, d)),                # Wq, bq
            head_spec((1, scan_h, d)), head_spec((1, 1, d)),           # Wk, bk
            head_spec((1, scan_h, d)), head_spec((1, 1, d)),           # Wv, bv
            head_spec((1, d, H)),                                      # Wo
            const_spec((1, H)), const_spec((1, H)), const_spec((1, H)),  # bo, gamma, beta
        ],
        out_specs=pl.BlockSpec((1, t_tile, H), lambda b, t, h: (b, t, 0)),
        scratch_shapes=[pltpu.VMEM((t_tile, H), jnp.float32)],
    )

    # Explicit VMEM budget sized from the actual tiles (important on v7x where
    # VMEM is 64 MiB): double-buffered blocks + accumulator + softmax buffers,
    # with generous headroom, clamped to a safe range.
    blk_bytes = (
        S * scan_h * 2 + t_tile * H * 4                # scan (bf16), hid (f32)
        + (H * d + 2 * scan_h * d + d * H) * 2         # per-head weights (bf16)
        + 3 * d * 4 + 3 * H * 4                        # biases, bo/gamma/beta
        + t_tile * H * 4                               # output block
    )
    work_bytes = 2 * blk_bytes + t_tile * H * 4 + 4 * t_tile * S * 4
    vmem_limit = int(min(48 * 1024 * 1024, max(16 * 1024 * 1024, 6 * work_bytes)))

    return pl.pallas_call(
        kernel,
        grid_spec=grid_spec,
        out_shape=jax.ShapeDtypeStruct((B, T, H), out_dtype),
        compiler_params=pltpu.CompilerParams(
            dimension_semantics=("parallel", "parallel", "arbitrary"),
            vmem_limit_bytes=vmem_limit,
        ),
    )(
        scan_bf, hid_f32,
        wq_h, bq_h, wk_h, bk_h, wv_h, bv_h,
        wo_h, bo, gamma, beta,
    )


def _reference(scan, hid, params, num_heads, ln_eps=1e-12):
    B, S, _ = scan.shape
    _, T, H = hid.shape
    d = H // num_heads
    q = hid @ params["wq"] + params["bq"]
    k = scan @ params["wk"] + params["bk"]
    v = scan @ params["wv"] + params["bv"]
    q = q.reshape(B, T, num_heads, d).transpose(0, 2, 1, 3)
    k = k.reshape(B, S, num_heads, d).transpose(0, 2, 1, 3)
    v = v.reshape(B, S, num_heads, d).transpose(0, 2, 1, 3)
    s = jnp.einsum("bhtd,bhsd->bhts", q, k) / math.sqrt(d)
    p = jax.nn.softmax(s, axis=-1)
    ctx = jnp.einsum("bhts,bhsd->bhtd", p, v)
    ctx = ctx.transpose(0, 2, 1, 3).reshape(B, T, H)
    x = ctx @ params["wo"] + params["bo"] + hid
    mean = x.mean(-1, keepdims=True)
    var = ((x - mean) ** 2).mean(-1, keepdims=True)
    return (x - mean) / jnp.sqrt(var + ln_eps) * params["gamma"] + params["beta"]


if __name__ == "__main__":
    # Small config consistent with the module.
    B, T, S = 2, 8, 16          # batch, text seq len, scan seq len
    H = 32                      # config.hidden_size
    SCAN_H = 24                 # config.scan_hidden_size
    NUM_HEADS = 4               # config.num_attention_heads

    key = jax.random.PRNGKey(0)
    ks = jax.random.split(key, 12)

    def init_w(k, shape, fan_in):
        return jax.random.normal(k, shape, jnp.float32) * (1.0 / math.sqrt(fan_in))

    params = {
        "wq": init_w(ks[0], (H, H), H),
        "bq": init_w(ks[1], (1, H), H),
        "wk": init_w(ks[2], (SCAN_H, H), SCAN_H),
        "bk": init_w(ks[3], (1, H), SCAN_H),
        "wv": init_w(ks[4], (SCAN_H, H), SCAN_H),
        "bv": init_w(ks[5], (1, H), SCAN_H),
        "wo": init_w(ks[6], (H, H), H),
        "bo": init_w(ks[7], (1, H), H),
        "gamma": jnp.ones((1, H), jnp.float32),
        "beta": jnp.zeros((1, H), jnp.float32),
    }

    scan_encodings = jax.random.normal(ks[8], (B, S, SCAN_H), jnp.float32)
    hidden_states = jax.random.normal(ks[9], (B, T, H), jnp.float32)
    attention_mask = jnp.zeros((B, 1, 1, S), jnp.float32)  # unused, matches PyTorch

    out = bert_scan_attention(scan_encodings, hidden_states, attention_mask,
                              params, num_heads=NUM_HEADS)
    out = jax.block_until_ready(out)

    ref = _reference(scan_encodings, hidden_states, params, NUM_HEADS)
    assert out.shape == (B, T, H)
    # bf16 MXU matmuls + approx softmax reciprocal -> compare against the f32
    # reference with a correspondingly looser (but still tight) tolerance.
    max_err = float(jnp.max(jnp.abs(out - ref)))
    assert jnp.allclose(out, ref, atol=6e-2, rtol=6e-2), (
        f"mismatch vs reference (max abs err {max_err:.4e})")

    print("KERNEL_OK")
</pallas_src>

<mosaic_0001>
module attributes {stable_mosaic.version = 11 : i64} {
  func.func @_bert_scan_attention_kernel(%arg0: i32, %arg1: i32, %arg2: i32, %arg3: memref<1x16x24xbf16, #tpu.memory_space<vmem>>, %arg4: memref<1x8x32xf32, #tpu.memory_space<vmem>>, %arg5: memref<1x32x8xbf16, #tpu.memory_space<vmem>>, %arg6: memref<1x1x8xf32, #tpu.memory_space<vmem>>, %arg7: memref<1x24x8xbf16, #tpu.memory_space<vmem>>, %arg8: memref<1x1x8xf32, #tpu.memory_space<vmem>>, %arg9: memref<1x24x8xbf16, #tpu.memory_space<vmem>>, %arg10: memref<1x1x8xf32, #tpu.memory_space<vmem>>, %arg11: memref<1x8x32xbf16, #tpu.memory_space<vmem>>, %arg12: memref<1x32xf32, #tpu.memory_space<vmem>>, %arg13: memref<1x32xf32, #tpu.memory_space<vmem>>, %arg14: memref<1x32xf32, #tpu.memory_space<vmem>>, %arg15: memref<1x8x32xf32, #tpu.memory_space<vmem>>, %arg16: memref<8x32xf32, #tpu.memory_space<vmem>>) attributes {dimension_semantics = [#tpu.dimension_semantics<parallel>, #tpu.dimension_semantics<parallel>, #tpu.dimension_semantics<arbitrary>], iteration_bounds = array<i64: 2, 1, 4>, scalar_prefetch = 0 : i64, scratch_operands = 1 : i64, tpu.core_type = #tpu.core_type<tc>, window_params = [{transform_indices = @transform_0, window_bounds = array<i64: 1, 16, 24>}, {transform_indices = @transform_1, window_bounds = array<i64: 1, 8, 32>}, {transform_indices = @transform_2, window_bounds = array<i64: 1, 32, 8>}, {transform_indices = @transform_3, window_bounds = array<i64: 1, 1, 8>}, {transform_indices = @transform_4, window_bounds = array<i64: 1, 24, 8>}, {transform_indices = @transform_5, window_bounds = array<i64: 1, 1, 8>}, {transform_indices = @transform_6, window_bounds = array<i64: 1, 24, 8>}, {transform_indices = @transform_7, window_bounds = array<i64: 1, 1, 8>}, {transform_indices = @transform_8, window_bounds = array<i64: 1, 8, 32>}, {pipeline_mode = #tpu.pipeline_mode<synchronous>, transform_indices = @transform_9, window_bounds = array<i64: 1, 32>}, {pipeline_mode = #tpu.pipeline_mode<synchronous>, transform_indices = @transform_10, window_bounds = array<i64: 1, 32>}, {pipeline_mode = #tpu.pipeline_mode<synchronous>, transform_indices = @transform_11, window_bounds = array<i64: 1, 32>}, {transform_indices = @transform_12, window_bounds = array<i64: 1, 8, 32>}]} {
    %c0 = arith.constant 0 : index
    %c0_0 = arith.constant 0 : index
    %c0_1 = arith.constant 0 : index
    %0 = vector.load %arg3[%c0, %c0_0, %c0_1] : memref<1x16x24xbf16, #tpu.memory_space<vmem>>, vector<1x16x24xbf16>
    %1 = vector.shape_cast %0 : vector<1x16x24xbf16> to vector<16x24xbf16>
    %c0_2 = arith.constant 0 : index
    %c0_3 = arith.constant 0 : index
    %c0_4 = arith.constant 0 : index
    %2 = vector.load %arg4[%c0_2, %c0_3, %c0_4] : memref<1x8x32xf32, #tpu.memory_space<vmem>>, vector<1x8x32xf32>
    %3 = vector.shape_cast %2 : vector<1x8x32xf32> to vector<8x32xf32>
    %4 = arith.truncf %3 : vector<8x32xf32> to vector<8x32xbf16>
    %c0_5 = arith.constant 0 : index
    %c0_6 = arith.constant 0 : index
    %c0_7 = arith.constant 0 : index
    %5 = vector.load %arg5[%c0_5, %c0_6, %c0_7] : memref<1x32x8xbf16, #tpu.memory_space<vmem>>, vector<1x32x8xbf16>
    %6 = vector.shape_cast %5 : vector<1x32x8xbf16> to vector<32x8xbf16>
    %cst = arith.constant dense<0.000000e+00> : vector<8x8xf32>
    %7 = tpu.matmul %4, %6, %cst {dimension_numbers = #tpu.dot_dimension_numbers<[1], [0], [0], [1], [0, 0, 1, 1], [], []>} : vector<8x32xbf16>, vector<32x8xbf16>, vector<8x8xf32> -> vector<8x8xf32>
    %c0_8 = arith.constant 0 : index
    %c0_9 = arith.constant 0 : index
    %c0_10 = arith.constant 0 : index
    %8 = vector.load %arg6[%c0_8, %c0_9, %c0_10] : memref<1x1x8xf32, #tpu.memory_space<vmem>>, vector<1x1x8xf32>
    %9 = vector.shape_cast %8 : vector<1x1x8xf32> to vector<1x8xf32>
    %10 = vector.broadcast %9 : vector<1x8xf32> to vector<8x8xf32>
    %11 = arith.addf %7, %10 : vector<8x8xf32>
    %c0_11 = arith.constant 0 : index
    %c0_12 = arith.constant 0 : index
    %c0_13 = arith.constant 0 : index
    %12 = vector.load %arg7[%c0_11, %c0_12, %c0_13] : memref<1x24x8xbf16, #tpu.memory_space<vmem>>, vector<1x24x8xbf16>
    %13 = vector.shape_cast %12 : vector<1x24x8xbf16> to vector<24x8xbf16>
    %cst_14 = arith.constant dense<0.000000e+00> : vector<16x8xf32>
    %14 = tpu.matmul %1, %13, %cst_14 {dimension_numbers = #tpu.dot_dimension_numbers<[1], [0], [0], [1], [0, 0, 1, 1], [], []>} : vector<16x24xbf16>, vector<24x8xbf16>, vector<16x8xf32> -> vector<16x8xf32>
    %c0_15 = arith.constant 0 : index
    %c0_16 = arith.constant 0 : index
    %c0_17 = arith.constant 0 : index
    %15 = vector.load %arg8[%c0_15, %c0_16, %c0_17] : memref<1x1x8xf32, #tpu.memory_space<vmem>>, vector<1x1x8xf32>
    %16 = vector.shape_cast %15 : vector<1x1x8xf32> to vector<1x8xf32>
    %17 = vector.broadcast %16 : vector<1x8xf32> to vector<16x8xf32>
    %18 = arith.addf %14, %17 : vector<16x8xf32>
    %c0_18 = arith.constant 0 : index
    %c0_19 = arith.constant 0 : index
    %c0_20 = arith.constant 0 : index
    %19 = vector.load %arg9[%c0_18, %c0_19, %c0_20] : memref<1x24x8xbf16, #tpu.memory_space<vmem>>, vector<1x24x8xbf16>
    %20 = vector.shape_cast %19 : vector<1x24x8xbf16> to vector<24x8xbf16>
    %cst_21 = arith.constant dense<0.000000e+00> : vector<16x8xf32>
    %21 = tpu.matmul %1, %20, %cst_21 {dimension_numbers = #tpu.dot_dimension_numbers<[1], [0], [0], [1], [0, 0, 1, 1], [], []>} : vector<16x24xbf16>, vector<24x8xbf16>, vector<16x8xf32> -> vector<16x8xf32>
    %c0_22 = arith.constant 0 : index
    %c0_23 = arith.constant 0 : index
    %c0_24 = arith.constant 0 : index
    %22 = vector.load %arg10[%c0_22, %c0_23, %c0_24] : memref<1x1x8xf32, #tpu.memory_space<vmem>>, vector<1x1x8xf32>
    %23 = vector.shape_cast %22 : vector<1x1x8xf32> to vector<1x8xf32>
    %24 = vector.broadcast %23 : vector<1x8xf32> to vector<16x8xf32>
    %25 = arith.addf %21, %24 : vector<16x8xf32>
    %26 = arith.truncf %11 : vector<8x8xf32> to vector<8x8xbf16>
    %27 = arith.truncf %18 : vector<16x8xf32> to vector<16x8xbf16>
    "tpu.trace_start"() <{level = 10 : i32, message = "td,sd->ts"}> : () -> ()
    %cst_25 = arith.constant dense<0.000000e+00> : vector<8x16xf32>
    %28 = tpu.matmul %26, %27, %cst_25 {dimension_numbers = #tpu.dot_dimension_numbers<[1], [1], [0], [0], [0, 0, 1, 0], [], []>} : vector<8x8xbf16>, vector<16x8xbf16>, vector<8x16xf32> -> vector<8x16xf32>
    "tpu.trace_stop"() : () -> ()
    %cst_26 = arith.constant 0.353553385 : f32
    %29 = vector.broadcast %cst_26 : f32 to vector<8x16xf32>
    %30 = arith.mulf %28, %29 : vector<8x16xf32>
    %cst_27 = arith.constant dense<0xFF800000> : vector<8xf32>
    %31 = vector.multi_reduction <maximumf>, %30, %cst_27 [1] : vector<8x16xf32> to vector<8xf32>
    %32 = vector.shape_cast %31 : vector<8xf32> to vector<8x1xf32>
    %33 = vector.broadcast %32 : vector<8x1xf32> to vector<8x16xf32>
    %34 = arith.subf %30, %33 : vector<8x16xf32>
    %35 = math.exp %34 : vector<8x16xf32>
    %cst_28 = arith.constant dense<0.000000e+00> : vector<8xf32>
    %36 = vector.multi_reduction <add>, %35, %cst_28 [1] : vector<8x16xf32> to vector<8xf32>
    %37 = vector.shape_cast %36 : vector<8xf32> to vector<8x1xf32>
    %38 = tpu.reciprocal %37 {approx = true} : vector<8x1xf32> -> vector<8x1xf32>
    %39 = vector.broadcast %38 : vector<8x1xf32> to vector<8x16xf32>
    %40 = arith.mulf %35, %39 : vector<8x16xf32>
    %41 = arith.truncf %40 : vector<8x16xf32> to vector<8x16xbf16>
    %42 = arith.truncf %25 : vector<16x8xf32> to vector<16x8xbf16>
    %cst_29 = arith.constant dense<0.000000e+00> : vector<8x8xf32>
    %43 = tpu.matmul %41, %42, %cst_29 {dimension_numbers = #tpu.dot_dimension_numbers<[1], [0], [0], [1], [0, 0, 1, 1], [], []>} : vector<8x16xbf16>, vector<16x8xbf16>, vector<8x8xf32> -> vector<8x8xf32>
    %44 = arith.truncf %43 : vector<8x8xf32> to vector<8x8xbf16>
    %c0_30 = arith.constant 0 : index
    %c0_31 = arith.constant 0 : index
    %c0_32 = arith.constant 0 : index
    %45 = vector.load %arg11[%c0_30, %c0_31, %c0_32] : memref<1x8x32xbf16, #tpu.memory_space<vmem>>, vector<1x8x32xbf16>
    %46 = vector.shape_cast %45 : vector<1x8x32xbf16> to vector<8x32xbf16>
    %cst_33 = arith.constant dense<0.000000e+00> : vector<8x32xf32>
    %47 = tpu.matmul %44, %46, %cst_33 {dimension_numbers = #tpu.dot_dimension_numbers<[1], [0], [0], [1], [0, 0, 1, 1], [], []>} : vector<8x8xbf16>, vector<8x32xbf16>, vector<8x32xf32> -> vector<8x32xf32>
    %c0_i32 = arith.constant 0 : i32
    %48 = arith.cmpi eq, %arg2, %c0_i32 : i32
    %49 = arith.extui %48 : i1 to i32
    %c0_i32_34 = arith.constant 0 : i32
    %50 = arith.cmpi ne, %49, %c0_i32_34 : i32
    scf.if %50 {
      %cst_40 = arith.constant 0.000000e+00 : f32
      %57 = vector.broadcast %cst_40 : f32 to vector<8x32xf32>
      %c0_41 = arith.constant 0 : index
      %c0_42 = arith.constant 0 : index
      %58 = vector.load %arg16[%c0_41, %c0_42] : memref<8x32xf32, #tpu.memory_space<vmem>>, vector<8x32xf32>
      tpu.vector_store %arg16[%c0_41, %c0_42], %57 {strides = array<i32>} : memref<8x32xf32, #tpu.memory_space<vmem>>, vector<8x32xf32>,
    } else {
    }
    %c0_35 = arith.constant 0 : index
    %c0_36 = arith.constant 0 : index
    %51 = vector.load %arg16[%c0_35, %c0_36] : memref<8x32xf32, #tpu.memory_space<vmem>>, vector<8x32xf32>
    %52 = arith.addf %51, %47 : vector<8x32xf32>
    %c0_37 = arith.constant 0 : index
    %c0_38 = arith.constant 0 : index
    %53 = vector.load %arg16[%c0_37, %c0_38] : memref<8x32xf32, #tpu.memory_space<vmem>>, vector<8x32xf32>
    tpu.vector_store %arg16[%c0_37, %c0_38], %52 {strides = array<i32>} : memref<8x32xf32, #tpu.memory_space<vmem>>, vector<8x32xf32>,
    %c3_i32 = arith.constant 3 : i32
    %54 = arith.cmpi eq, %arg2, %c3_i32 : i32
    %55 = arith.extui %54 : i1 to i32
    %c0_i32_39 = arith.constant 0 : i32
    %56 = arith.cmpi ne, %55, %c0_i32_39 : i32
    scf.if %56 {
      %c0_40 = arith.constant 0 : index
      %c0_41 = arith.constant 0 : index
      %57 = vector.load %arg16[%c0_40, %c0_41] : memref<8x32xf32, #tpu.memory_space<vmem>>, vector<8x32xf32>
      %c0_42 = arith.constant 0 : index
      %c0_43 = arith.constant 0 : index
      %58 = vector.load %arg12[%c0_42, %c0_43] : memref<1x32xf32, #tpu.memory_space<vmem>>, vector<1x32xf32>
      %59 = vector.broadcast %58 : vector<1x32xf32> to vector<8x32xf32>
      %60 = arith.addf %57, %59 : vector<8x32xf32>
      %61 = arith.addf %60, %3 : vector<8x32xf32>
      %cst_44 = arith.constant dense<0.000000e+00> : vector<8xf32>
      %62 = vector.multi_reduction <add>, %61, %cst_44 [1] : vector<8x32xf32> to vector<8xf32>
      %63 = vector.shape_cast %62 : vector<8xf32> to vector<8x1xf32>
      %cst_45 = arith.constant 3.200000e+01 : f32
      %64 = vector.broadcast %cst_45 : f32 to vector<8x1xf32>
      %65 = arith.divf %63, %64 : vector<8x1xf32>
      %66 = vector.broadcast %65 : vector<8x1xf32> to vector<8x32xf32>
      %67 = arith.subf %61, %66 : vector<8x32xf32>
      %68 = arith.mulf %67, %67 : vector<8x32xf32>
      %cst_46 = arith.constant dense<0.000000e+00> : vector<8xf32>
      %69 = vector.multi_reduction <add>, %68, %cst_46 [1] : vector<8x32xf32> to vector<8xf32>
      %70 = vector.shape_cast %69 : vector<8xf32> to vector<8x1xf32>
      %cst_47 = arith.constant 3.200000e+01 : f32
      %71 = vector.broadcast %cst_47 : f32 to vector<8x1xf32>
      %72 = arith.divf %70, %71 : vector<8x1xf32>
      %cst_48 = arith.constant 9.99999996E-13 : f32
      %73 = vector.broadcast %cst_48 : f32 to vector<8x1xf32>
      %74 = arith.addf %72, %73 : vector<8x1xf32>
      %75 = math.rsqrt %74 : vector<8x1xf32>
      %76 = vector.broadcast %75 : vector<8x1xf32> to vector<8x32xf32>
      %77 = arith.mulf %67, %76 : vector<8x32xf32>
      %c0_49 = arith.constant 0 : index
      %c0_50 = arith.constant 0 : index
      %78 = vector.load %arg13[%c0_49, %c0_50] : memref<1x32xf32, #tpu.memory_space<vmem>>, vector<1x32xf32>
      %79 = vector.broadcast %78 : vector<1x32xf32> to vector<8x32xf32>
      %80 = arith.mulf %77, %79 : vector<8x32xf32>
      %c0_51 = arith.constant 0 : index
      %c0_52 = arith.constant 0 : index
      %81 = vector.load %arg14[%c0_51, %c0_52] : memref<1x32xf32, #tpu.memory_space<vmem>>, vector<1x32xf32>
      %82 = vector.broadcast %81 : vector<1x32xf32> to vector<8x32xf32>
      %83 = arith.addf %80, %82 : vector<8x32xf32>
      %c0_53 = arith.constant 0 : index
      %c0_54 = arith.constant 0 : index
      %c0_55 = arith.constant 0 : index
      %84 = vector.load %arg15[%c0_53, %c0_54, %c0_55] : memref<1x8x32xf32, #tpu.memory_space<vmem>>, vector<1x8x32xf32>
      %85 = vector.shape_cast %84 : vector<1x8x32xf32> to vector<8x32xf32>
      %86 = vector.shape_cast %83 : vector<8x32xf32> to vector<1x8x32xf32>
      tpu.vector_store %arg15[%c0_53, %c0_54, %c0_55], %86 {strides = array<i32>} : memref<1x8x32xf32, #tpu.memory_space<vmem>>, vector<1x8x32xf32>,
    } else {
    }
    return
  }
  func.func @transform_0(%arg0: i32, %arg1: i32, %arg2: i32) -> (i32, i32, i32) {
    %c0_i32 = arith.constant 0 : i32
    %c0_i32_0 = arith.constant 0 : i32
    %c0_i32_1 = arith.constant 0 : i32
    return %arg0, %c0_i32, %c0_i32_0 : i32, i32, i32
  }
  func.func @transform_1(%arg0: i32, %arg1: i32, %arg2: i32) -> (i32, i32, i32) {
    %c0_i32 = arith.constant 0 : i32
    %c0_i32_0 = arith.constant 0 : i32
    return %arg0, %arg1, %c0_i32 : i32, i32, i32
  }
  func.func @transform_2(%arg0: i32, %arg1: i32, %arg2: i32) -> (i32, i32, i32) {
    %c0_i32 = arith.constant 0 : i32
    %c0_i32_0 = arith.constant 0 : i32
    %c0_i32_1 = arith.constant 0 : i32
    return %arg2, %c0_i32, %c0_i32_0 : i32, i32, i32
  }
  func.func @transform_3(%arg0: i32, %arg1: i32, %arg2: i32) -> (i32, i32, i32) {
    %c0_i32 = arith.constant 0 : i32
    %c0_i32_0 = arith.constant 0 : i32
    %c0_i32_1 = arith.constant 0 : i32
    return %arg2, %c0_i32, %c0_i32_0 : i32, i32, i32
  }
  func.func @transform_4(%arg0: i32, %arg1: i32, %arg2: i32) -> (i32, i32, i32) {
    %c0_i32 = arith.constant 0 : i32
    %c0_i32_0 = arith.constant 0 : i32
    %c0_i32_1 = arith.constant 0 : i32
    return %arg2, %c0_i32, %c0_i32_0 : i32, i32, i32
  }
  func.func @transform_5(%arg0: i32, %arg1: i32, %arg2: i32) -> (i32, i32, i32) {
    %c0_i32 = arith.constant 0 : i32
    %c0_i32_0 = arith.constant 0 : i32
    %c0_i32_1 = arith.constant 0 : i32
    return %arg2, %c0_i32, %c0_i32_0 : i32, i32, i32
  }
  func.func @transform_6(%arg0: i32, %arg1: i32, %arg2: i32) -> (i32, i32, i32) {
    %c0_i32 = arith.constant 0 : i32
    %c0_i32_0 = arith.constant 0 : i32
    %c0_i32_1 = arith.constant 0 : i32
    return %arg2, %c0_i32, %c0_i32_0 : i32, i32, i32
  }
  func.func @transform_7(%arg0: i32, %arg1: i32, %arg2: i32) -> (i32, i32, i32) {
    %c0_i32 = arith.constant 0 : i32
    %c0_i32_0 = arith.constant 0 : i32
    %c0_i32_1 = arith.constant 0 : i32
    return %arg2, %c0_i32, %c0_i32_0 : i32, i32, i32
  }
  func.func @transform_8(%arg0: i32, %arg1: i32, %arg2: i32) -> (i32, i32, i32) {
    %c0_i32 = arith.constant 0 : i32
    %c0_i32_0 = arith.constant 0 : i32
    %c0_i32_1 = arith.constant 0 : i32
    return %arg2, %c0_i32, %c0_i32_0 : i32, i32, i32
  }
  func.func @transform_9(%arg0: i32, %arg1: i32, %arg2: i32) -> (i32, i32) {
    %c0_i32 = arith.constant 0 : i32
    %c0_i32_0 = arith.constant 0 : i32
    %c0_i32_1 = arith.constant 0 : i32
    return %c0_i32, %c0_i32_0 : i32, i32
  }
  func.func @transform_10(%arg0: i32, %arg1: i32, %arg2: i32) -> (i32, i32) {
    %c0_i32 = arith.constant 0 : i32
    %c0_i32_0 = arith.constant 0 : i32
    %c0_i32_1 = arith.constant 0 : i32
    return %c0_i32, %c0_i32_0 : i32, i32
  }
  func.func @transform_11(%arg0: i32, %arg1: i32, %arg2: i32) -> (i32, i32) {
    %c0_i32 = arith.constant 0 : i32
    %c0_i32_0 = arith.constant 0 : i32
    %c0_i32_1 = arith.constant 0 : i32
    return %c0_i32, %c0_i32_0 : i32, i32
  }
  func.func @transform_12(%arg0: i32, %arg1: i32, %arg2: i32) -> (i32, i32, i32) {
    %c0_i32 = arith.constant 0 : i32
    %c0_i32_0 = arith.constant 0 : i32
    return %arg0, %arg1, %c0_i32 : i32, i32, i32
  }
}

</mosaic_0001>

<bundles_post_ra>
// kernel: tpu_custom_call.1
= control target key start
LH: loop header
LB: loop body
LE: loop exit
PB: predicated region body
PF: predicated region fallthrough
CT: control target
= control target key end

     0   :  { %17 = vsyncpa [#allocation4], 0  ;;  %s1746_s0 = inlined_call_operand.vmem [shape: bf16[2,16,24], index: 0, kind: input, shape index: {}]   ;;  %s1747_s1 = inlined_call_operand.vmem [shape: f32[2,8,32], index: 1, kind: input, shape index: {}]   ;;  %s1748_s2 = inlined_call_operand.vmem [shape: bf16[4,32,8], index: 2, kind: input, shape index: {}]   ;;  %s1749_s3 = inlined_call_operand.vmem [shape: f32[4,1,8], index: 3, kind: input, shape index: {}]   ;;  %s1750_s4 = inlined_call_operand.vmem [shape: bf16[4,24,8], index: 4, kind: input, shape index: {}]   ;;  %s1751_s5 = inlined_call_operand.vmem [shape: f32[4,1,8], index: 5, kind: input, shape index: {}]   ;;  %s1752_s6 = inlined_call_operand.vmem [shape: bf16[4,24,8], index: 6, kind: input, shape index: {}]   ;;  %s1753_s7 = inlined_call_operand.vmem [shape: f32[4,1,8], index: 7, kind: input, shape index: {}]   ;;  %s1754_s8 = inlined_call_operand.vmem [shape: bf16[4,8,32], index: 8, kind: input, shape index: {}]   ;;  %s1755_s9 = inlined_call_operand.vmem [shape: f32[1,32], index: 9, kind: input, shape index: {}]   ;;  %s1756_s10 = inlined_call_operand.vmem [shape: f32[1,32], index: 10, kind: input, shape index: {}]   ;;  %s1757_s11 = inlined_call_operand.vmem [shape: f32[1,32], index: 11, kind: input, shape index: {}]   ;;  %s1758_s12 = inlined_call_operand.hbm [shape: f32[2,8,32], index: 12, kind: output, shape index: {}]  }
   0x1   :  { %19 = vsyncpa [#allocation4 + $0x1], 0  ;;  %s1524_s21 = smov 0   ;;  %s1526_s22 = smov 0  }
   0x2   :  { %s1528_s23 = smov 0   ;;  %s1530_s24 = smov 0  }
   0x3   :  { %s1532_s25 = smov 0   ;;  %s1534_s26 = smov 0  }
   0x4   :  { %s1536_s27 = smov 0   ;;  %s1538_s28 = smov 0  }
   0x5 LB: > { %1766 = sst [smem:[#allocation6_spill]] %s1433_s23  ;;  %s1175_s29 = sadd.s32 4294967295, %s1453_s28   ;;  %s1453_s28 = sphi %s1538_s28, %s25_s28   ;;  %s1449_s27 = sphi %s1536_s27, %s1783_s27   ;;  %s1445_s26 = sphi %s1534_s26, %s1782_s26   ;;  %s1441_s25 = sphi %s1532_s25, %s1781_s25   ;;  %s1437_s24 = sphi %s1530_s24, %s1780_s24   ;;  %s1433_s23 = sphi %s1528_s23, %s1786_s23   ;;  %s1429_s22 = sphi %s1526_s22, %s1785_s22   ;;  %s1425_s21 = sphi %s1524_s21, %s1784_s21  }
   0x6   : > { %1767 = sst [smem:[#allocation7_spill]] %s1445_s26  ;;  %s1176_s30 = sadd.s32 4294967294, %s1453_s28  }
   0x7   : > { %1768 = sst [smem:[#allocation8_spill]] %s1449_s27  ;;  %s37_s13 = sadd.s32 1, %s1445_s26 }
   0x8   : > { %p38_p0 = scmp.ge.s32.totalorder %s37_s13, 4  ;;  %s44_s14 = sadd.s32 1, %s1449_s27 }
   0x9   : > { %p362_p1 = scmp.ne.s32.totalorder %s1433_s23, %s1429_s22  ;;  %p363_p2 = scmp.eq.s32.totalorder %s1175_s29, 7 }
   0xa   : > { %s1788_s13 = smov (%p38_p0, %s37_s13), 0  ;;  %s1790_s14 = smov (!%p38_p0, %s44_s14), %s1449_s27 }
   0xb   : > { %1769 = sst [smem:[#allocation9_spill]] %s1788_s13  ;;  %p1573_p3 = por %p363_p2, %p362_p1 }
   0xc   : > { %p368_p4 = scmp.ne.s32.totalorder %s1429_s22, %s1425_s21  ;;  %p46_p5 = scmp.ge.s32.totalorder %s1790_s14, 2 }
   0xd   : > { %p369_p6 = scmp.eq.s32.totalorder %s1176_s30, 7  ;;  %p1179_p7 = scmp.ge.s32.totalorder %s1453_s28, 1 }
   0xe   : > { %p463_p8 = scmp.lt.s32.totalorder %s1453_s28, 9  ;;  %s1792_s14 = smov (%p46_p5, %s1790_s14), 0 }
   0xf   : > { %1771 = sst [smem:[#allocation10_spill]] %s1792_s14  ;;  %p1583_p9 = por %p369_p6, %p368_p4 }
  0x10   : > { %p464_p10 = pnand %p1179_p7, %p463_p8  ;;  %s347_s17 = ssub.s32 %s1449_s27, %s1792_s14 }
  0x11   : > { %s1772_s16 = scalar_select %p1583_p9, 1, 0 }
  0x12   : > { %s352_s18 = sadd.s32 1, %s1433_s23  ;;  %p350_p11 = scmp.eq.s32.totalorder %s347_s17, 0 }
  0x13   : > { %1773 = sst [smem:[#allocation11_spill]] %s1772_s16  ;;  %467 = sbr.rel (%p464_p10) target bundleno = 1506 (0x5e2), region = 68 }
  0x14   : > { %s1591_s19 = scalar_select %p350_p11, %s1433_s23, %s352_s18  }
  0x15   : > { %p552_p12 = scmp.lt.s32.totalorder (!%p464_p10), %s1437_s24, 3  ;;  %s1760_s20 = sand.u32 (!%p464_p10), 1, %s1429_s22  }
  0x16   : > { %1774 = sst [smem:[#allocation12_spill]] %s1591_s19  ;;  %s1598_s29 = sshll.u32 (!%p464_p10), %s1760_s20, 3 }
  0x17   : > { %p540_p13 = scmp.lt.s32.totalorder (!%p464_p10), %s1441_s25, 1  ;;  %p1205_p0 = scmp.ne.s32.totalorder (!%p464_p10), %s1437_s24, 0 }
  0x18   : > { %v1455_v0 = vmov 0.0   ;;  %s1602_s30 = scalar_select %p552_p12, %s1437_s24, 3  ;;  %vm1456_vm0 = vmmov 0   ;;  %vm680_vm1 = vcmask 1043456   ;;  %vm608_vm2 = vcmask 261120  }
  0x19   : > { %1239 = vmatprep.subr.bf16.mxu1 %v1455_v0  ;;  %1231 = vmatprep.subr.bf16.mxu0 %v1455_v0  ;;  %s541_s23 = scalar_select %p540_p13, %s1441_s25, 1  ;;  %vm676_vm3 = vcmask 195584   ;;  %vm790_vm4 = vcmask 64512   ;;  %vm838_vm5 = vcmask 130048  }
  0x1a   : > { %1243 = vmatprep.mubr.msk.bf16.mxu1 %vm1456_vm0, %v1455_v0  ;;  %1235 = vmatprep.mubr.msk.bf16.mxu0 %vm1456_vm0, %v1455_v0  ;;  %s1765_s17 = smul.u32 12, %s1602_s30  ;;  %s1215_s18 = sshll.u32 %s1602_s30, 4 }
  0x1b   : > { %s556_s13 = scalar_lea.vmem %s1748_s2, %s1215_s18  ;;  %s1214_s16 = sshll.u32 %s541_s23, 3 }
  0x1c   : > { %s564_s19 = scalar_lea.vmem %s1750_s4, %s1765_s17  ;;  %v1350_v1 = vld [vmem:[%s556_s13 + $0x8] sm:$0xff]   ;;  %v1352_v4 = vld [vmem:[%s556_s13] sm:$0xff]   ;;  %s544_s26 = scalar_lea.vmem %s1746_s0, %s1214_s16 }
  0x1d   : > { %v1348_v2 = vld [vmem:[%s564_s19 + $0x8] ss:$0 sps:$4 sm:$0xff]   ;;  %1232 = vmatpush3.bf16.msra.mxu0 %v1350_v1  ;;  %v1349_v5 = vld [vmem:[%s564_s19] sm:$0xff]   ;;  %s551_s17 = scalar_lea.vmem %s1747_s1, %s1214_s16  ;;  %s567_s16 = scalar_lea.vmem %s1751_s5, %s1602_s30 }
  0x1e   : > { %v682_v3 = vsel %vm680_vm1, %v1348_v2, 0  ;;  %1233 = vmatprep.subr.bf16.mxu0 %v1455_v0  ;;  %v1351_v6 = vld [vmem:[%s544_s26] sm:$0xff]   ;;  %s559_s14 = scalar_lea.vmem %s1749_s3, %s1602_s30  ;;  %s1775_s20 = smul.u32 12, %s1602_s30 }
  0x1f   : > { %1240 = vmatpush3.bf16.msra.mxu1 %v682_v3  ;;  %v1629_v7 = vld [vmem:[%s551_s17] sm:$0xff]  ;;  %s1188_s19 = sshll.u32 %s1602_s30, 2 }
  0x20   : > { %1241 = vmatprep.subr.bf16.mxu1 %v1455_v0  ;;  %v584_v8 = vpack.c.bf16 %v1629_v7, %v1629_v7  ;;  %v1193_v12 = vld [vmem:[%s567_s16] ss:$0 sm:$0xff]  ;;  %s572_s18 = scalar_lea.vmem %s1752_s6, %s1775_s20  ;;  %s575_s16 = scalar_lea.vmem %s1753_s7, %s1602_s30 }
  0x21   : > { %1234 = vmatpush3.bf16.msra.mxu0 %v1352_v4  ;;  %v1189_v20 = vld [vmem:[%s559_s14] ss:$0 sm:$0xff]  ;;  %v1353_v25 = vld [vmem:[%s572_s18 + $0x8] ss:$0 sps:$4 sm:$0xff]   ;;  %s579_s20 = scalar_lea.vmem %s1754_s8, %s1188_s19  ;;  %s539_s30 = scalar_lea.vmem [#allocation3], %s1598_s29 }
  0x22   : > { %1247 = vmatprep.subr.bf16.mxu0 %v1455_v0  ;;  %v745_v26 = vsel %vm680_vm1, %v1353_v25, 0  ;;  %v1354_v27 = vld [vmem:[%s572_s18] sm:$0xff]  }
  0x23   : > { %1242 = vmatpush3.bf16.msra.mxu1 %v1349_v5  ;;  %v1198_v41 = vld [vmem:[%s575_s16] ss:$0 sm:$0xff] }
  0x24   : > { %1255 = vmatprep.subr.bf16.mxu1 %v1455_v0  ;;  %1236 = vmatmul.mubr.msk.bf16.vlgmr.msra.gmra.mxu0 %vm608_vm2, %v584_v8  ;;  %v896_v47 = vld [vmem:[%s579_s20] sm:$0xf] }
  0x25   : > { %1251 = vmatprep.mubr.msk.bf16.mxu0 %vm1456_vm0, %v1455_v0  ;;  %1248 = vmatpush3.bf16.msra.mxu0 %v745_v26  ;;  %v901_v48 = vsel %vm680_vm1, %v896_v47, 0 }
  0x26   : > { %1244 = vmatmul.mubr.msk.bf16.vlgmr.msra.gmra.mxu1 %vm676_vm3, %v1351_v6  ;;  %1249 = vmatprep.subr.bf16.mxu0 %v1455_v0 }
  0x27   : > { %1257 = vmatprep.mubr.msk.bf16.mxu1 %vm1456_vm0, %v1455_v0 }
  0x29   : > { %1250 = vmatpush3.bf16.msra.mxu0 %v1354_v27 }
  0x2a   : > { %1261 = vmatprep.subr.bf16.mxu0 %v1455_v0 }
  0x2c   : > { %1252 = vmatmul.mubr.msk.bf16.vlgmr.msra.gmra.mxu0 %vm676_vm3, %v1351_v6 }
  0x2d   : > { %1263 = vmatprep.mubr.msk.bf16.mxu0 %vm1456_vm0, %v1455_v0 }
  0xe4   : > { %v646_v9 = vpop.f32.mrf.mxu0 }
  0xe5   : > { %v647_v22 = vadd.f32 %v1189_v20, %v646_v9 }
  0xe6   : > { %v718_v10 = vpop.f32.mrf.mxu1  ;;  %v1237_v11 = vpop.f32.mrf.mxu0 }
  0xe7   : > { %v719_v16 = vadd.f32 %v1193_v12, %v718_v10  ;;  %v788_v24 = vpack.c.bf16 %v647_v22, %v647_v22 }
  0xe8   : > { %v1245_v13 = vpop.f32.mrf.mxu1  ;;  %v649_v14 = vpop.f32.mrf.mxu0 }
  0xea   : > { %v721_v15 = vpop.f32.mrf.mxu1  ;;  %v1238_v18 = vpop.f32.mrf.mxu0 }
  0xeb   : > { %v722_v17 = vadd.f32 %v1193_v12, %v721_v15 }
  0xec   : > { %v1246_v19 = vpop.f32.mrf.mxu1  ;;  %v781_v34 = vpop.f32.mrf.mxu0 }
  0xed   : > { %v789_v21 = vpack.c.bf16 %v722_v17, %v719_v16  ;;  %v782_v42 = vadd.f32 %v1198_v41, %v781_v34 }
  0xee   : > { %v1253_v35 = vpop.f32.mrf.mxu0 }
  0xef   : > { %v795_v23 = vsel %vm790_vm4, %v789_v21, 0 }
  0xf0   : > { %1256 = vmatpush3.bf16.xpose.msra.mxu1 %v795_v23  ;;  %v784_v43 = vpop.f32.mrf.mxu0 }
  0xf1   : > { %1267 = vmatprep.subr.bf16.mxu1 %v1455_v0  ;;  %v785_v44 = vadd.f32 %v1198_v41, %v784_v43 }
  0xf2   : > { %v1254_v45 = vpop.f32.mrf.mxu0 }
  0xf3   : > { %v851_v46 = vpack.c.bf16 %v785_v44, %v782_v42 }
  0xf5   : > { %1262 = vmatpush3.bf16.msra.mxu0 %v851_v46 }
  0xf7   : > { %1258 = vmatmul.mubr.msk.bf16.vlgmr.msra.gmra.mxu1 %vm790_vm4, %v788_v24 }
  0xf8   : > { %1269 = vmatprep.mubr.msk.bf16.mxu1 %vm1456_vm0, %v1455_v0  ;;  %1268 = vmatpush3.bf16.msra.mxu1 %v901_v48 }
 0x1b7   : > { %v831_v28 = vpop.f32.mrf.mxu1 }
 0x1b8   : > { %v837_v29 = vmul.f32 0.35355338, %v831_v28 }
 0x1b9   : > { %v1259_v30 = vpop.f32.mrf.mxu1 }
 0x1ba   : > { %v839_v31 = vsel %vm838_vm5, %v837_v29, -inf }
 0x1bb   : > { %840 = vmax.xlane.f32.xlu0 %v839_v31  ;;  %v834_v32 = vpop.f32.mrf.mxu1 }
 0x1bd   : > { %v1260_v33 = vpop.f32.mrf.mxu1 }
 0x244   : > { %v841_v36 = vpop.xlane.xlu0 %840 }
 0x245   : > { %v842_v37 = vsub.f32 %v837_v29, %v841_v36 }
 0x247   : > { %v843_v38 = vmul.f32 1.442695, %v842_v37 }
 0x249   : > { %1355 = vpow2.f32 %v843_v38 }
 0x256   : > { %v1356_v39 = vpop.eup %1355 }
 0x257   : > { %v845_v40 = vsel %vm838_vm5, %v1356_v39, 0.0 }
 0x258   : > { %846 = vadd.xlane.f32.xlu0 %v845_v40 }
 0x2e1   : > { %v847_v49 = vpop.xlane.xlu0 %846 }
 0x2e2   : > { %1357 = vrcp.f32 %v847_v49 }
 0x2ef   : > { %v1358_v50 = vpop.eup %1357 }
 0x2f0   : > { %v849_v51 = vmul.f32 %v1358_v50, %v1356_v39 }
 0x2f2   : > { %v850_v52 = vpack.c.bf16 %v849_v51, %v849_v51 }
 0x2f4   : > { %1264 = vmatmul.mubr.msk.bf16.vlgmr.msra.gmra.mxu0 %vm838_vm5, %v850_v52 }
 0x3b4   : > { %v889_v53 = vpop.f32.mrf.mxu0 }
 0x3b5   : > { %v895_v54 = vpack.c.bf16 %v889_v53, %v889_v53 }
 0x3b6   : > { %v1265_v55 = vpop.f32.mrf.mxu0 }
 0x3b7   : > { %1270 = vmatmul.mubr.msk.bf16.vlgmr.msra.gmra.mxu1 %vm790_vm4, %v895_v54 }
 0x3b8   : > { %v892_v56 = vpop.f32.mrf.mxu0 }
 0x3ba   : > { %v1266_v57 = vpop.f32.mrf.mxu0 }
 0x477   : > { %v937_v58 = vpop.f32.mrf.mxu1 }
 0x479   : > { %v1271_v59 = vpop.f32.mrf.mxu1  ;;  %946 = sbr.rel (%p1205_p0) target bundleno = 1152 (0x480), region = 72 }
 0x47b   : > { %v940_v60 = vpop.f32.mrf.mxu1 }
 0x47d   : > { %v1272_v61 = vpop.f32.mrf.mxu1 }
 0x47e   : > { %v1457_v62 = vmov 0.0  }
 0x47f   : > { %947 = vst.msk [vmem:[#allocation2] sm:$0xff] %vm608_vm2, %v1457_v62 }
 0x480 PF: > { %p1206_p1 = scmp.ne.s32.totalorder %s1437_s24, 3 }
 0x485   : > { %954 = sbr.rel (%p1206_p1) target bundleno = 1482 (0x5ca), region = 76 }
 0x486   : > { %v948_v63 = vld [vmem:[#allocation2] sm:$0xff] }
 0x487   : > { %v949_v0 = vadd.f32 %v948_v63, %v937_v58 }
 0x489   : > { %950 = vst.msk [vmem:[#allocation2] sm:$0xff] %vm608_vm2, %v949_v0 }
 0x48a   : > { %v1207_v2 = vld [vmem:[%s1755_s9] ss:$0 sm:$0xff] }
 0x48b   : > { %v1209_v17 = vld [vmem:[%s1757_s11] ss:$0 sm:$0xff] }
 0x490   : > { %v955_v1 = vld [vmem:[#allocation2] sm:$0xff] }
 0x491   : > { %v963_v3 = vadd.f32 %v1207_v2, %v955_v1 }
 0x493   : > { %v964_v4 = vadd.f32 %v963_v3, %v1629_v7  ;;  %v1208_v7 = vld [vmem:[%s1756_s10] ss:$0 sm:$0xff] }
 0x495   : > { %v965_v5 = vsel %vm608_vm2, %v964_v4, 0.0 }
 0x496   : > { %966 = vadd.xlane.f32.xlu0 %v965_v5 }
 0x51f   : > { %v967_v6 = vpop.xlane.xlu0 %966 }
 0x520   : > { %v969_v8 = vmul.f32 0.03125, %v967_v6 }
 0x522   : > { %v970_v9 = vsub.f32 %v964_v4, %v969_v8 }
 0x524   : > { %v971_v10 = vmul.f32 %v970_v9, %v970_v9 }
 0x526   : > { %v972_v11 = vsel %vm608_vm2, %v971_v10, 0.0 }
 0x527   : > { %973 = vadd.xlane.f32.xlu0 %v972_v11 }
 0x5b0   : > { %v974_v12 = vpop.xlane.xlu0 %973 }
 0x5b1   : > { %v975_v13 = vmul.f32 0.03125, %v974_v12 }
 0x5b3   : > { %v976_v14 = vadd.f32 1e-12, %v975_v13 }
 0x5b5   : > { %1359 = vrsqrt.f32 %v976_v14 }
 0x5c2   : > { %v1360_v15 = vpop.eup %1359 }
 0x5c3   : > { %v978_v16 = vmul.f32 %v1360_v15, %v970_v9 }
 0x5c5   : > { %v986_v18 = vmul.f32 %v1208_v7, %v978_v16 }
 0x5c7   : > { %v994_v19 = vadd.f32 %v1209_v17, %v986_v18 }
 0x5c9   : > { %995 = vst.msk [vmem:[%s539_s30] sm:$0xff] %vm608_vm2, %v994_v19 }
 0x5ca PF: > { %s1211_s16 = sshll.u32 %s1441_s25, 7  ;;  %s1011_s20 = sshll.u32 %s539_s30, 4  ;;  %s1012_s20 = int_to_ptr.vmem [resolvable:$true] %s1011_s20 }
 0x5cb   : > { %s1009_s14 = scalar_lea.hbm %s1758_s12, %s1211_s16  ;;  %s1776_s26 = sand.u32 1, %s1429_s22  }
 0x5cc   : > { %s997_s27 = scalar_lea.sflag [#allocation4], %s1776_s26  ;;  %s1361_s24 = scalar_lea.vmem %s1012_s20, 128 }
 0x5cd   : > { %p1362_p2 = scmp.ne.s32.totalorder %s1012_s20, %s1361_s24  ;;  %s1458_s18 = smov [#allocation3]  }
 0x5ce   : > { %s1365_s23 = sshll.u32 %s1458_s18, 4  ;;  %s1366_s23 = int_to_ptr.vmem [resolvable:$false] %s1365_s23 }
 0x5cf   : > { %p1363_p4 = pnand %p1362_p2, %p1573_p3  ;;  %s1367_s13 = scalar_lea.vmem %s1366_s23, 256 }
 0x5d0   : > { %p1368_p6 = scmp.lt.s32.totalorder %s1012_s20, %s1366_s23  ;;  %p1369_p7 = scmp.lt.s32.totalorder %s1367_s13, %s1361_s24 }
 0x5d1   : > { %p1364_p5 = pneg %p1363_p4 }
 0x5d2   : > { %p1370_p8 = por %p1369_p7, %p1368_p6 }
 0x5d4   : > { %p1371_p10 = pnand %p1370_p8, %p1364_p5 }
 0x5d6   : > { %1374 = shalt.err (!%p1371_p10)
}
 0x5d7   : > { %s1375_s25 = scalar_lea.hbm %s1009_s14, 128  ;;  %s1379_s16 = scalar_lea.hbm %s1758_s12, 256 }
 0x5d8   : > { %p1376_p11 = scmp.ne.s32.totalorder %s1009_s14, %s1375_s25  ;;  %p1380_p0 = scmp.lt.s32.totalorder %s1009_s14, %s1758_s12 }
 0x5d9   : > { %p1381_p1 = scmp.lt.s32.totalorder %s1379_s16, %s1375_s25 }
 0x5da   : > { %p1377_p12 = pnand %p1376_p11, %p1573_p3 }
 0x5db   : > { %p1382_p2 = por %p1381_p1, %p1380_p0 }
 0x5dc   : > { %p1378_p13 = pneg %p1377_p12 }
 0x5de   : > { %p1383_p4 = pnand %p1382_p2, %p1378_p13 }
 0x5e0   : > { %1386 = shalt.err (!%p1383_p4)
}
 0x5e1   : > { %1274 = dma.vmem_to_hbm [thread:$0]  (%p1573_p3), %s1012_s20, 128, %s1009_s14, %s997_s27  }
 0x5e2 PF: > { %p1280_p5 = scmp.ge.s32.totalorder %s1453_s28, 2  ;;  %s1023_s24 = sand.u32 1, %s1425_s21  }
 0x5e3   : > { %s1024_s18 = scalar_lea.sflag [#allocation4], %s1023_s24 }
 0x5e4   : > { %p1277_p6 = pnand %p1280_p5, %p1583_p9 }
 0x5e6   : > { %p1278_p7 = pneg %p1277_p6 }
 0x5e8   : > { %1420 = dma.done.wait (%p1278_p7), %s1024_s18, 128  }
 0x5e9   : > { %1422 = vsyncadd (%p1278_p7), %s1024_s18, 4294967168  ;;  %s25_s28 = sadd.s32 1, %s1453_s28   ;;  %s1778_s23 = sld [smem:[#allocation6_spill]] }
 0x5ea   : > { %p22_p8 = scmp.ge.s32.totalorder %s25_s28, 10   ;;  %s1779_s13 = sld [smem:[#allocation12_spill]] }
 0x5eb   : > { %s1780_s24 = sld [smem:[#allocation7_spill]]  ;;  %s1784_s21 = smov %s1429_s22 }
 0x5ec   : > { %s1781_s25 = sld [smem:[#allocation8_spill]]  ;;  %24 = sbr.rel (!%p22_p8) target bundleno = 5 (0x5), region = 135 }
 0x5ed   : > { %s1782_s26 = sld [smem:[#allocation9_spill]] }
 0x5ee   : > { %s1783_s27 = sld [smem:[#allocation10_spill]] }
 0x5ef   : > { %s1785_s22 = smov %s1778_s23 }
 0x5f0   : > { %s1786_s23 = smov %s1779_s13 }
 0x5f1   :  { %1029 = vsyncpa [#allocation4], 1 }
 0x5f2   :  { %1031 = vsyncpa [#allocation4 + $0x1], 1 }

</bundles_post_ra>
